<compile_context>
chip_gen: v7x
topology: tpu7x:2x2x1
jax: 0.10.0
libtpu: 0.0.40
codegen_flags: <defaults>
</compile_context>

<pallas_src>
import functools

import jax
import jax.numpy as jnp
from jax.experimental import pallas as pl
from jax.experimental.pallas import tpu as pltpu


# ---------------------------------------------------------------------------
# Squeeze-excite gate helper: Csq = C // squeeze_factor is tiny (2-4), so the
# two 1x1 convs are broadcast-multiply + lane reduce on the VPU/XLU (no MXU).
# ---------------------------------------------------------------------------
def _se_gate(pooled, w1_ref, b1_ref, w2t_ref, b2_ref, csq):
    """pooled: (B, C) f32 -> sigmoid gate (B, C) f32. C stays on the lane axis."""
    w1 = w1_ref[...].astype(jnp.float32)      # (Csq, C)
    w2t = w2t_ref[...].astype(jnp.float32)    # (Csq, C) == W2.T
    b1 = b1_ref[...].astype(jnp.float32)      # (1, Csq)
    b2 = b2_ref[...].astype(jnp.float32)      # (1, C)

    y = jnp.zeros(pooled.shape, jnp.float32) + b2                        # (B, C)
    for j in range(csq):                                                 # tiny static loop
        hj = jnp.sum(pooled * w1[j:j + 1, :], axis=-1, keepdims=True)    # (B, 1)
        hj = jnp.maximum(hj + b1[:, j:j + 1], 0.0)                       # ReLU
        y = y + hj * w2t[j:j + 1, :]                                     # (B, C)
    return jax.nn.sigmoid(y)


def _fused_kernel(x_ref, w1_ref, b1_ref, w2t_ref, b2_ref, o_ref, *, inv_hw, csq):
    """Single pass: the whole (B_TILE, C, HW) slab fits in one block."""
    x = x_ref[...]                                               # (B, C, HWp)
    pooled = jnp.sum(x.astype(jnp.float32), axis=-1) * inv_hw    # (B, C)
    y = _se_gate(pooled, w1_ref, b1_ref, w2t_ref, b2_ref, csq)   # (B, C) f32
    o_ref[...] = (x * y.astype(x.dtype)[:, :, None]).astype(o_ref.dtype)


def _pool_gate_kernel(x_ref, w1_ref, b1_ref, w2t_ref, b2_ref, y_ref, acc_ref,
                      *, inv_hw, csq):
    """Pass 1 (HW-tiled reduction): accumulate per-channel sums, emit gate at end."""
    hw = pl.program_id(1)

    @pl.when(hw == 0)
    def _():
        acc_ref[...] = jnp.zeros_like(acc_ref)

    acc_ref[...] += jnp.sum(x_ref[...].astype(jnp.float32), axis=-1)     # (B, C)

    @pl.when(hw == pl.num_programs(1) - 1)
    def _():
        pooled = acc_ref[...] * inv_hw     # divide by TRUE HW (padding is zeros)
        y_ref[...] = _se_gate(pooled, w1_ref, b1_ref, w2t_ref, b2_ref,
                              csq).astype(y_ref.dtype)


def _scale_kernel(x_ref, y_ref, o_ref):
    """Pass 2 (HW-tiled, fully parallel): out = x * y broadcast over HW."""
    x = x_ref[...]                                               # (B, C, HW_TILE)
    y = y_ref[...].astype(x.dtype)                               # (B, C)
    o_ref[...] = (x * y[:, :, None]).astype(o_ref.dtype)


def _pick_tiles(N, C, HW, itemsize, block_bytes_target):
    # Batch tile: largest divisor of N up to 8 (amortizes per-grid-step overhead).
    b_tile = 1
    for cand in range(min(N, 8), 0, -1):
        if N % cand == 0:
            b_tile = cand
            break
    # HW tile: lane-dense multiple of 128, capped so one x block stays in budget.
    hw_ceil = -(-HW // 128) * 128
    max_lanes = max(128, (block_bytes_target // (b_tile * C * itemsize)) // 128 * 128)
    hw_tile = min(hw_ceil, max_lanes)
    hw_pad = -(-HW // hw_tile) * hw_tile
    return b_tile, hw_tile, hw_pad


def channel_attention(x, w1, b1, w2, b2, *, block_bytes_target=4 * 1024 * 1024):
    """RCAN ChannelAttention forward.

    x: (N, C, H, W); w1: (Csq, C); b1: (Csq,); w2: (C, Csq); b2: (C,).
    Returns x * sigmoid(W2 relu(W1 gap(x) + b1) + b2), same shape/dtype as x.
    """
    N, C, H, W = x.shape
    HW = H * W
    Csq = w1.shape[0]
    itemsize = jnp.dtype(x.dtype).itemsize

    b_tile, hw_tile, hw_pad = _pick_tiles(N, C, HW, itemsize, block_bytes_target)
    n_b = N // b_tile
    n_hw = hw_pad // hw_tile

    x_flat = x.reshape(N, C, HW)
    if hw_pad != HW:
        # Zero-pad spatial to a lane-dense multiple of the tile; zeros do not
        # perturb the pooled sum (we divide by the true HW) and the padded
        # output lanes are sliced off below.
        x_flat = jnp.pad(x_flat, ((0, 0), (0, 0), (0, hw_pad - HW)))

    w2_t = jnp.transpose(w2)            # (Csq, C): keep C on the lane axis
    b1_2d = b1.reshape(1, Csq)
    b2_2d = b2.reshape(1, C)

    inv_hw = 1.0 / float(HW)
    x_block_bytes = b_tile * C * hw_tile * itemsize
    # 2x in + 2x out double-buffered blocks, plus headroom for params/scratch.
    vmem_limit = min(64 * 1024 * 1024,
                     max(32 * 1024 * 1024, 4 * x_block_bytes + 4 * 1024 * 1024))

    if n_hw == 1:
        # ----- fused single-pass path (small feature maps) ------------------
        kernel = functools.partial(_fused_kernel, inv_hw=inv_hw, csq=Csq)
        out_flat = pl.pallas_call(
            kernel,
            out_shape=jax.ShapeDtypeStruct((N, C, hw_pad), x.dtype),
            grid_spec=pltpu.PrefetchScalarGridSpec(
                num_scalar_prefetch=0,
                grid=(n_b,),
                in_specs=[
                    pl.BlockSpec((b_tile, C, hw_pad), lambda b: (b, 0, 0)),
                    pl.BlockSpec((Csq, C), lambda b: (0, 0)),
                    pl.BlockSpec((1, Csq), lambda b: (0, 0)),
                    pl.BlockSpec((Csq, C), lambda b: (0, 0)),
                    pl.BlockSpec((1, C), lambda b: (0, 0)),
                ],
                out_specs=pl.BlockSpec((b_tile, C, hw_pad), lambda b: (b, 0, 0)),
            ),
            compiler_params=pltpu.CompilerParams(
                dimension_semantics=("parallel",),
                vmem_limit_bytes=vmem_limit),
        )(x_flat, w1, b1_2d, w2_t, b2_2d)
    else:
        # ----- pass 1: HW-tiled pooling + gate (reduction axis last) --------
        gate_kernel = functools.partial(_pool_gate_kernel, inv_hw=inv_hw, csq=Csq)
        y = pl.pallas_call(
            gate_kernel,
            out_shape=jax.ShapeDtypeStruct((N, C), jnp.float32),
            grid_spec=pltpu.PrefetchScalarGridSpec(
                num_scalar_prefetch=0,
                grid=(n_b, n_hw),
                in_specs=[
                    pl.BlockSpec((b_tile, C, hw_tile), lambda b, h: (b, 0, h)),
                    pl.BlockSpec((Csq, C), lambda b, h: (0, 0)),
                    pl.BlockSpec((1, Csq), lambda b, h: (0, 0)),
                    pl.BlockSpec((Csq, C), lambda b, h: (0, 0)),
                    pl.BlockSpec((1, C), lambda b, h: (0, 0)),
                ],
                out_specs=pl.BlockSpec((b_tile, C), lambda b, h: (b, 0)),
                scratch_shapes=[pltpu.VMEM((b_tile, C), jnp.float32)],
            ),
            compiler_params=pltpu.CompilerParams(
                dimension_semantics=("parallel", "arbitrary"),
                vmem_limit_bytes=vmem_limit),
        )(x_flat, w1, b1_2d, w2_t, b2_2d)

        # ----- pass 2: HW-tiled scale, both axes parallel --------------------
        out_flat = pl.pallas_call(
            _scale_kernel,
            out_shape=jax.ShapeDtypeStruct((N, C, hw_pad), x.dtype),
            grid_spec=pltpu.PrefetchScalarGridSpec(
                num_scalar_prefetch=0,
                grid=(n_b, n_hw),
                in_specs=[
                    pl.BlockSpec((b_tile, C, hw_tile), lambda b, h: (b, 0, h)),
                    pl.BlockSpec((b_tile, C), lambda b, h: (b, 0)),
                ],
                out_specs=pl.BlockSpec((b_tile, C, hw_tile), lambda b, h: (b, 0, h)),
            ),
            compiler_params=pltpu.CompilerParams(
                dimension_semantics=("parallel", "parallel"),
                vmem_limit_bytes=vmem_limit),
        )(x_flat, y)

    if hw_pad != HW:
        out_flat = out_flat[:, :, :HW]
    return out_flat.reshape(N, C, H, W)


def _reference(x, w1, b1, w2, b2):
    # Pure-JAX reference of the PyTorch module.
    pooled = jnp.mean(x, axis=(2, 3))                        # (N, C)
    h = jnp.maximum(pooled @ w1.T + b1, 0.0)                 # (N, Csq)
    y = jax.nn.sigmoid(h @ w2.T + b2)                        # (N, C)
    return x * y[:, :, None, None]


if __name__ == "__main__":
    key = jax.random.PRNGKey(0)
    kx, kw1, kb1, kw2, kb2, kx2 = jax.random.split(key, 6)

    # num_feat=32, squeeze_factor=16 -> hidden channels = 2
    N, C, SQUEEZE = 2, 32, 16
    Csq = C // SQUEEZE

    w1 = jax.random.normal(kw1, (Csq, C), dtype=jnp.float32) * 0.1   # Conv2d(C, Csq, 1) weight
    b1 = jax.random.normal(kb1, (Csq,), dtype=jnp.float32) * 0.1
    w2 = jax.random.normal(kw2, (C, Csq), dtype=jnp.float32) * 0.1   # Conv2d(Csq, C, 1) weight
    b2 = jax.random.normal(kb2, (C,), dtype=jnp.float32) * 0.1

    # --- test 1: small map -> fused single-pass path ------------------------
    x = jax.random.normal(kx, (N, C, 16, 16), dtype=jnp.float32)
    out = jax.block_until_ready(channel_attention(x, w1, b1, w2, b2))
    ref = _reference(x, w1, b1, w2, b2)
    assert out.shape == x.shape and out.dtype == x.dtype
    assert jnp.allclose(out, ref, atol=1e-5, rtol=1e-5)

    # --- test 2: non-128-multiple HW + tiny block budget -> two-pass path ---
    x2 = jax.random.normal(kx2, (N, C, 13, 13), dtype=jnp.float32)
    out2 = jax.block_until_ready(
        channel_attention(x2, w1, b1, w2, b2,
                          block_bytes_target=2 * C * 128 * 4))
    ref2 = _reference(x2, w1, b1, w2, b2)
    assert out2.shape == x2.shape and out2.dtype == x2.dtype
    assert jnp.allclose(out2, ref2, atol=1e-5, rtol=1e-5)

    print("KERNEL_OK")
</pallas_src>

<mosaic_0001>
module attributes {stable_mosaic.version = 11 : i64} {
  func.func @_fused_kernel(%arg0: i32, %arg1: memref<2x32x256xf32, #tpu.memory_space<vmem>>, %arg2: memref<2x32xf32, #tpu.memory_space<vmem>>, %arg3: memref<1x2xf32, #tpu.memory_space<vmem>>, %arg4: memref<2x32xf32, #tpu.memory_space<vmem>>, %arg5: memref<1x32xf32, #tpu.memory_space<vmem>>, %arg6: memref<2x32x256xf32, #tpu.memory_space<vmem>>) attributes {dimension_semantics = [#tpu.dimension_semantics<parallel>], iteration_bounds = array<i64: 1>, scalar_prefetch = 0 : i64, scratch_operands = 0 : i64, tpu.core_type = #tpu.core_type<tc>, window_params = [{transform_indices = @transform_0, window_bounds = array<i64: 2, 32, 256>}, {pipeline_mode = #tpu.pipeline_mode<synchronous>, transform_indices = @transform_1, window_bounds = array<i64: 2, 32>}, {pipeline_mode = #tpu.pipeline_mode<synchronous>, transform_indices = @transform_2, window_bounds = array<i64: 1, 2>}, {pipeline_mode = #tpu.pipeline_mode<synchronous>, transform_indices = @transform_3, window_bounds = array<i64: 2, 32>}, {pipeline_mode = #tpu.pipeline_mode<synchronous>, transform_indices = @transform_4, window_bounds = array<i64: 1, 32>}, {transform_indices = @transform_5, window_bounds = array<i64: 2, 32, 256>}]} {
    %c0 = arith.constant 0 : index
    %c0_0 = arith.constant 0 : index
    %c0_1 = arith.constant 0 : index
    %0 = vector.load %arg1[%c0, %c0_0, %c0_1] : memref<2x32x256xf32, #tpu.memory_space<vmem>>, vector<2x32x256xf32>
    %cst = arith.constant dense<0.000000e+00> : vector<2x32xf32>
    %1 = vector.multi_reduction <add>, %0, %cst [2] : vector<2x32x256xf32> to vector<2x32xf32>
    %cst_2 = arith.constant 3.906250e-03 : f32
    %2 = vector.broadcast %cst_2 : f32 to vector<2x32xf32>
    %3 = arith.mulf %1, %2 : vector<2x32xf32>
    %c0_3 = arith.constant 0 : index
    %c0_4 = arith.constant 0 : index
    %4 = vector.load %arg2[%c0_3, %c0_4] : memref<2x32xf32, #tpu.memory_space<vmem>>, vector<2x32xf32>
    %c0_5 = arith.constant 0 : index
    %c0_6 = arith.constant 0 : index
    %5 = vector.load %arg4[%c0_5, %c0_6] : memref<2x32xf32, #tpu.memory_space<vmem>>, vector<2x32xf32>
    %c0_7 = arith.constant 0 : index
    %c0_8 = arith.constant 0 : index
    %6 = vector.load %arg3[%c0_7, %c0_8] : memref<1x2xf32, #tpu.memory_space<vmem>>, vector<1x2xf32>
    %c0_9 = arith.constant 0 : index
    %c0_10 = arith.constant 0 : index
    %7 = vector.load %arg5[%c0_9, %c0_10] : memref<1x32xf32, #tpu.memory_space<vmem>>, vector<1x32xf32>
    %cst_11 = arith.constant 0.000000e+00 : f32
    %8 = vector.broadcast %cst_11 : f32 to vector<2x32xf32>
    %9 = vector.broadcast %7 : vector<1x32xf32> to vector<2x32xf32>
    %10 = arith.addf %8, %9 : vector<2x32xf32>
    %11 = vector.extract_strided_slice %4 {offsets = [0, 0], sizes = [1, 32], strides = [1, 1]} : vector<2x32xf32> to vector<1x32xf32>
    %12 = vector.broadcast %11 : vector<1x32xf32> to vector<2x32xf32>
    %13 = arith.mulf %3, %12 : vector<2x32xf32>
    %cst_12 = arith.constant dense<0.000000e+00> : vector<2xf32>
    %14 = vector.multi_reduction <add>, %13, %cst_12 [1] : vector<2x32xf32> to vector<2xf32>
    %15 = vector.shape_cast %14 : vector<2xf32> to vector<2x1xf32>
    %16 = vector.extract_strided_slice %6 {offsets = [0, 0], sizes = [1, 1], strides = [1, 1]} : vector<1x2xf32> to vector<1x1xf32>
    %17 = vector.broadcast %16 : vector<1x1xf32> to vector<2x1xf32>
    %18 = arith.addf %15, %17 : vector<2x1xf32>
    %cst_13 = arith.constant 0.000000e+00 : f32
    %19 = vector.broadcast %cst_13 : f32 to vector<2x1xf32>
    %20 = arith.maximumf %18, %19 : vector<2x1xf32>
    %21 = vector.extract_strided_slice %5 {offsets = [0, 0], sizes = [1, 32], strides = [1, 1]} : vector<2x32xf32> to vector<1x32xf32>
    %22 = vector.broadcast %20 : vector<2x1xf32> to vector<2x32xf32>
    %23 = vector.broadcast %21 : vector<1x32xf32> to vector<2x32xf32>
    %24 = arith.mulf %22, %23 : vector<2x32xf32>
    %25 = arith.addf %10, %24 : vector<2x32xf32>
    %26 = vector.extract_strided_slice %4 {offsets = [1, 0], sizes = [1, 32], strides = [1, 1]} : vector<2x32xf32> to vector<1x32xf32>
    %27 = vector.broadcast %26 : vector<1x32xf32> to vector<2x32xf32>
    %28 = arith.mulf %3, %27 : vector<2x32xf32>
    %cst_14 = arith.constant dense<0.000000e+00> : vector<2xf32>
    %29 = vector.multi_reduction <add>, %28, %cst_14 [1] : vector<2x32xf32> to vector<2xf32>
    %30 = vector.shape_cast %29 : vector<2xf32> to vector<2x1xf32>
    %31 = vector.extract_strided_slice %6 {offsets = [0, 1], sizes = [1, 1], strides = [1, 1]} : vector<1x2xf32> to vector<1x1xf32>
    %32 = vector.broadcast %31 : vector<1x1xf32> to vector<2x1xf32>
    %33 = arith.addf %30, %32 : vector<2x1xf32>
    %cst_15 = arith.constant 0.000000e+00 : f32
    %34 = vector.broadcast %cst_15 : f32 to vector<2x1xf32>
    %35 = arith.maximumf %33, %34 : vector<2x1xf32>
    %36 = vector.extract_strided_slice %5 {offsets = [1, 0], sizes = [1, 32], strides = [1, 1]} : vector<2x32xf32> to vector<1x32xf32>
    %37 = vector.broadcast %35 : vector<2x1xf32> to vector<2x32xf32>
    %38 = vector.broadcast %36 : vector<1x32xf32> to vector<2x32xf32>
    %39 = arith.mulf %37, %38 : vector<2x32xf32>
    %40 = arith.addf %25, %39 : vector<2x32xf32>
    %41 = arith.negf %40 : vector<2x32xf32>
    %42 = math.exp %41 : vector<2x32xf32>
    %cst_16 = arith.constant 1.000000e+00 : f32
    %43 = vector.broadcast %cst_16 : f32 to vector<2x32xf32>
    %44 = arith.addf %43, %42 : vector<2x32xf32>
    %45 = arith.divf %43, %44 : vector<2x32xf32>
    %46 = vector.shape_cast %45 : vector<2x32xf32> to vector<2x32x1xf32>
    %47 = vector.broadcast %46 : vector<2x32x1xf32> to vector<2x32x256xf32>
    %48 = arith.mulf %0, %47 : vector<2x32x256xf32>
    %c0_17 = arith.constant 0 : index
    %c0_18 = arith.constant 0 : index
    %c0_19 = arith.constant 0 : index
    %49 = vector.load %arg6[%c0_17, %c0_18, %c0_19] : memref<2x32x256xf32, #tpu.memory_space<vmem>>, vector<2x32x256xf32>
    tpu.vector_store %arg6[%c0_17, %c0_18, %c0_19], %48 {strides = array<i32>} : memref<2x32x256xf32, #tpu.memory_space<vmem>>, vector<2x32x256xf32>,
    return
  }
  func.func @transform_0(%arg0: i32) -> (i32, i32, i32) {
    %c0_i32 = arith.constant 0 : i32
    %c0_i32_0 = arith.constant 0 : i32
    %c0_i32_1 = arith.constant 0 : i32
    return %arg0, %c0_i32, %c0_i32_0 : i32, i32, i32
  }
  func.func @transform_1(%arg0: i32) -> (i32, i32) {
    %c0_i32 = arith.constant 0 : i32
    %c0_i32_0 = arith.constant 0 : i32
    %c0_i32_1 = arith.constant 0 : i32
    return %c0_i32, %c0_i32_0 : i32, i32
  }
  func.func @transform_2(%arg0: i32) -> (i32, i32) {
    %c0_i32 = arith.constant 0 : i32
    %c0_i32_0 = arith.constant 0 : i32
    %c0_i32_1 = arith.constant 0 : i32
    return %c0_i32, %c0_i32_0 : i32, i32
  }
  func.func @transform_3(%arg0: i32) -> (i32, i32) {
    %c0_i32 = arith.constant 0 : i32
    %c0_i32_0 = arith.constant 0 : i32
    %c0_i32_1 = arith.constant 0 : i32
    return %c0_i32, %c0_i32_0 : i32, i32
  }
  func.func @transform_4(%arg0: i32) -> (i32, i32) {
    %c0_i32 = arith.constant 0 : i32
    %c0_i32_0 = arith.constant 0 : i32
    %c0_i32_1 = arith.constant 0 : i32
    return %c0_i32, %c0_i32_0 : i32, i32
  }
  func.func @transform_5(%arg0: i32) -> (i32, i32, i32) {
    %c0_i32 = arith.constant 0 : i32
    %c0_i32_0 = arith.constant 0 : i32
    %c0_i32_1 = arith.constant 0 : i32
    return %arg0, %c0_i32, %c0_i32_0 : i32, i32, i32
  }
}

</mosaic_0001>

<bundles_post_ra>
// kernel: tpu_custom_call.1
= control target key start
LH: loop header
LB: loop body
LE: loop exit
PB: predicated region body
PF: predicated region fallthrough
CT: control target
= control target key end

     0   :  { %10 = vsyncpa [#allocation3], 0  ;;  %s686_s0 = inlined_call_operand.hbm [shape: f32[2,32,256], index: 0, kind: input, shape index: {}]   ;;  %s687_s1 = inlined_call_operand.vmem [shape: f32[2,32], index: 1, kind: input, shape index: {}]   ;;  %s688_s2 = inlined_call_operand.vmem [shape: f32[1,2], index: 2, kind: input, shape index: {}]   ;;  %s689_s3 = inlined_call_operand.vmem [shape: f32[2,32], index: 3, kind: input, shape index: {}]   ;;  %s690_s4 = inlined_call_operand.vmem [shape: f32[1,32], index: 4, kind: input, shape index: {}]   ;;  %s691_s5 = inlined_call_operand.hbm [shape: f32[2,32,256], index: 5, kind: output, shape index: {}]  }
   0x1   :  { %11 = vsyncpa [#allocation4], 0  ;;  %s508_s18 = smov [#allocation2]   ;;  %s460_s22 = scalar_lea.hbm %s686_s0, 2048 }
   0x2   :  { %s17_s19 = sshll.u32 %s508_s18, 4  ;;  %p461_p0 = scmp.ne.s32.totalorder %s686_s0, %s460_s22  ;;  %s18_s19 = int_to_ptr.vmem [resolvable:$true] %s17_s19 }
   0x3   :  { %p464_p1 = scmp.lt.u32.totalorder %s460_s22, %s686_s0 }
   0x5   :  { %p466_p2 = pnand %p464_p1, %p461_p0 }
   0x7   :  { %469 = shalt.err (!%p466_p2)
}
   0x8   :  { %s470_s27 = scalar_lea.vmem %s18_s19, 2048  ;;  %p475_p4 = scmp.lt.s32.totalorder %s18_s19, %s18_s19 }
   0x9   :  { %p471_p3 = scmp.ne.s32.totalorder %s18_s19, %s470_s27  ;;  %p476_p5 = scmp.lt.s32.totalorder %s470_s27, %s470_s27 }
   0xb   :  { %p477_p6 = por %p476_p5, %p475_p4 }
   0xd   :  { %p478_p7 = pnand %p477_p6, %p471_p3 }
   0xf   :  { %481 = shalt.err (!%p478_p7)
}
  0x10   :  { %s509_s28 = smov 256   ;;  %s510_s29 = smov 16  }
  0x11   :  { %23 = dma.hbm_to_vmem [thread:$0]  %s686_s0, 2048, %s18_s19, [#allocation3], %s509_s28, %s509_s28, %s510_s29  }
  0x12   :  { %504 = dma.done.wait [#allocation3], 2048  }
  0x13   :  { %505 = vsyncadd [#allocation3], 4294965248  ;;  %v559_v0 = vld [vmem:[#allocation2 + $0x40] sm:$0xff]  ;;  %v561_v1 = vld [vmem:[#allocation2 + $0x48] sm:$0xff]  ;;  %v94_v24 = vlaneseq  ;;  %v511_v30 = vmov 0   ;;  %vm169_vm0 = vcmask 130112  }
  0x14   :  { %v563_v2 = vld [vmem:[#allocation2] sm:$0xff]  ;;  %v63_v3 = vadd.f32 %v561_v1, %v559_v0  ;;  %v567_v4 = vld [vmem:[#allocation2 + $0x8] sm:$0xff]  ;;  %v569_v5 = vld [vmem:[#allocation2 + $0x50] sm:$0xff]  ;;  %453 = vset.pattern.permute.xlu1 %v511_v30  ;;  %452 = vset.pattern.permute.xlu0 %v511_v30  ;;  %vm176_vm1 = vcmask 195712   ;;  %vm183_vm2 = vcmask 261312   ;;  %vm204_vm3 = vcmask 1041409  }
  0x15   :  { %v571_v6 = vld [vmem:[#allocation2 + $0x58] sm:$0xff]  ;;  %v51_v7 = vadd.f32 %v567_v4, %v563_v2  ;;  %v575_v8 = vld [vmem:[#allocation2 + $0x10] sm:$0xff]  ;;  %v583_v12 = vld [vmem:[#allocation2 + $0x60] sm:$0xff]  ;;  %v608_v25 = vshrl.u32 %v94_v24, 7  ;;  %vm207_vm4 = vcmask 254976  }
  0x16   :  { %v577_v9 = vld [vmem:[#allocation2 + $0x18] sm:$0xff]  ;;  %64 = vadd.xlane.f32.xlu1 %v63_v3  ;;  %v66_v10 = vadd.f32 %v571_v6, %v569_v5  ;;  %v585_v13 = vld [vmem:[#allocation2 + $0x68] sm:$0xff]  ;;  %v587_v14 = vld [vmem:[#allocation2 + $0x20] sm:$0xff] }
  0x17   :  { %52 = vadd.xlane.f32.xlu0 %v51_v7  ;;  %v54_v11 = vadd.f32 %v577_v9, %v575_v8  ;;  %v589_v15 = vld [vmem:[#allocation2 + $0x28] sm:$0xff]  ;;  %v69_v16 = vadd.f32 %v585_v13, %v583_v12  ;;  %v595_v18 = vld [vmem:[#allocation2 + $0x70] sm:$0xff]  ;;  %v597_v19 = vld [vmem:[#allocation2 + $0x78] sm:$0xff]  ;;  %v611_v26 = vsub.s32 0, %v608_v25  ;;  %v618_v29 = vsub.s32 1, %v608_v25 }
  0x18   :  { %v57_v17 = vadd.f32 %v589_v15, %v587_v14  ;;  %v599_v20 = vld [vmem:[#allocation2 + $0x30] sm:$0xff]  ;;  %v601_v21 = vld [vmem:[#allocation2 + $0x38] sm:$0xff]  ;;  %v72_v22 = vadd.f32 %v597_v19, %v595_v18  ;;  %v83_v27 = vld [vmem:[%s687_s1] sm:$0x3] }
  0x19   :  { %v60_v23 = vadd.f32 %v601_v21, %v599_v20  ;;  %v97_v28 = vrot.slane %v83_v27, %v611_v26  ;;  %v233_v31 = vrot.slane %v83_v27, %v618_v29  ;;  %v159_v27 = vand.u32 127, %v94_v24 }
  0x1a   :  { %67 = vadd.xlane.f32.xlu1 %v66_v10 }
  0x1b   :  { %55 = vadd.xlane.f32.xlu0 %v54_v11  ;;  %v164_v30 = vadd.s32 4294967288, %v159_v27 }
  0x1e   :  { %70 = vadd.xlane.f32.xlu1 %v69_v16 }
  0x1f   :  { %58 = vadd.xlane.f32.xlu0 %v57_v17 }
  0x22   :  { %73 = vadd.xlane.f32.xlu1 %v72_v22 }
  0x23   :  { %61 = vadd.xlane.f32.xlu0 %v60_v23 }
  0x33   :  { %104 = vbcast.lane.b32.xlu1 %v97_v28, 264 }
  0x37   :  { %108 = vbcast.lane.b32.xlu1 %v97_v28, 272 }
  0x39   :  { %100 = vbcast.lane.b32.xlu0 %v97_v28, 256 }
  0x3b   :  { %112 = vbcast.lane.b32.xlu1 %v97_v28, 280 }
  0x3d   :  { %236 = vbcast.lane.b32.xlu0 %v233_v31, 256 }
  0x3f   :  { %240 = vbcast.lane.b32.xlu1 %v233_v31, 264 }
  0x41   :  { %244 = vbcast.lane.b32.xlu0 %v233_v31, 272 }
  0x43   :  { %248 = vbcast.lane.b32.xlu1 %v233_v31, 280 }
  0xa3   :  { %v65_v32 = vpop.xlane.xlu1 %64 }
  0xa4   :  { %v53_v33 = vpop.xlane.xlu0 %52  ;;  %v79_v46 = vmul.f32 0.00390625, %v65_v32  ;;  %v171_v32 = vadd.s32 4294967280, %v159_v27 }
  0xa5   :  { %v75_v41 = vmul.f32 0.00390625, %v53_v33 }
  0xa7   :  { %v68_v34 = vpop.xlane.xlu1 %67 }
  0xa8   :  { %v56_v35 = vpop.xlane.xlu0 %55  ;;  %v80_v47 = vmul.f32 0.00390625, %v68_v34  ;;  %v167_v34 = vsub.s32 %v164_v30, %v608_v25 }
  0xa9   :  { %v76_v40 = vmul.f32 0.00390625, %v56_v35  ;;  %v162_v35 = vsub.s32 %v159_v27, %v608_v25 }
  0xab   :  { %v71_v36 = vpop.xlane.xlu1 %70 }
  0xac   :  { %v59_v37 = vpop.xlane.xlu0 %58  ;;  %v81_v52 = vmul.f32 0.00390625, %v71_v36 }
  0xad   :  { %v77_v51 = vmul.f32 0.00390625, %v59_v37  ;;  %v178_v37 = vadd.s32 4294967272, %v159_v27 }
  0xaf   :  { %v74_v38 = vpop.xlane.xlu1 %73 }
  0xb0   :  { %v62_v39 = vpop.xlane.xlu0 %61  ;;  %v82_v57 = vmul.f32 0.00390625, %v74_v38  ;;  %v174_v38 = vsub.s32 %v171_v32, %v608_v25 }
  0xb1   :  { %v78_v56 = vmul.f32 0.00390625, %v62_v39 }
  0xb3   :  { %v105_v42 = vpop.permute.xlu1 %104 }
  0xb4   :  { %v119_v43 = vmul.f32 %v105_v42, %v76_v40  ;;  %v101_v44 = vpop.permute.xlu0 %100  ;;  %v123_v50 = vmul.f32 %v105_v42, %v80_v47 }
  0xb5   :  { %v118_v45 = vmul.f32 %v101_v44, %v75_v41  ;;  %v122_v49 = vmul.f32 %v101_v44, %v79_v46 }
  0xb6   :  { %138 = vperm.xlu1 %453, %v119_v43   ;;  %v181_v43 = vsub.s32 %v178_v37, %v608_v25 }
  0xb7   :  { %135 = vperm.xlu0 %452, %v118_v45   ;;  %v109_v48 = vpop.permute.xlu1 %108 }
  0xb8   :  { %v120_v53 = vmul.f32 %v109_v48, %v77_v51  ;;  %v124_v55 = vmul.f32 %v109_v48, %v81_v52  ;;  %v237_v59 = vpop.permute.xlu0 %236 }
  0xb9   :  { %v254_v62 = vmul.f32 %v237_v59, %v75_v41  ;;  %v258_v3 = vmul.f32 %v237_v59, %v79_v46 }
  0xba   :  { %147 = vperm.xlu1 %453, %v122_v49  }
  0xbb   :  { %150 = vperm.xlu0 %452, %v123_v50   ;;  %v113_v54 = vpop.permute.xlu1 %112 }
  0xbc   :  { %v121_v58 = vmul.f32 %v113_v54, %v78_v56  ;;  %v125_v60 = vmul.f32 %v113_v54, %v82_v57  ;;  %v245_v7 = vpop.permute.xlu0 %244 }
  0xbd   :  { %v256_v11 = vmul.f32 %v245_v7, %v77_v51  ;;  %v260_v16 = vmul.f32 %v245_v7, %v81_v52 }
  0xbe   :  { %141 = vperm.xlu1 %453, %v120_v53  }
  0xbf   :  { %153 = vperm.xlu0 %452, %v124_v55   ;;  %v241_v61 = vpop.permute.xlu1 %240 }
  0xc0   :  { %v255_v63 = vmul.f32 %v241_v61, %v76_v40  ;;  %v259_v10 = vmul.f32 %v241_v61, %v80_v47 }
  0xc2   :  { %144 = vperm.xlu1 %453, %v121_v58  }
  0xc3   :  { %156 = vperm.xlu0 %452, %v125_v60   ;;  %v249_v17 = vpop.permute.xlu1 %248 }
  0xc4   :  { %v257_v22 = vmul.f32 %v249_v17, %v78_v56  ;;  %v261_v23 = vmul.f32 %v249_v17, %v82_v57 }
  0xc6   :  { %271 = vperm.xlu1 %453, %v254_v62  }
  0xc7   :  { %274 = vperm.xlu0 %452, %v255_v63  }
  0xca   :  { %283 = vperm.xlu1 %453, %v258_v3  }
  0xcb   :  { %286 = vperm.xlu0 %452, %v259_v10  }
  0xce   :  { %277 = vperm.xlu1 %453, %v256_v11  }
  0xcf   :  { %289 = vperm.xlu0 %452, %v260_v16  }
  0xd2   :  { %280 = vperm.xlu1 %453, %v257_v22  }
  0xd3   :  { %292 = vperm.xlu0 %452, %v261_v23  }
 0x135   :  { %v139_v28 = vpop.permute.xlu1 %138 }
 0x136   :  { %v136_v31 = vpop.permute.xlu0 %135  ;;  %v168_v40 = vrot.slane %v139_v28, %v167_v34 }
 0x137   :  { %v163_v41 = vrot.slane %v136_v31, %v162_v35 }
 0x139   :  { %v148_v33 = vpop.permute.xlu1 %147  ;;  %v170_v48 = vsel %vm169_vm0, %v168_v40, %v163_v41 }
 0x13a   :  { %v151_v36 = vpop.permute.xlu0 %150  ;;  %v188_v24 = vrot.slane %v148_v33, %v162_v35 }
 0x13b   :  { %v192_v44 = vrot.slane %v151_v36, %v167_v34 }
 0x13d   :  { %v142_v39 = vpop.permute.xlu1 %141  ;;  %v193_v51 = vsel %vm169_vm0, %v192_v44, %v188_v24 }
 0x13e   :  { %v154_v42 = vpop.permute.xlu0 %153  ;;  %v175_v45 = vrot.slane %v142_v39, %v174_v38  ;;  %v444_v39 = vld [vmem:[%s688_s2] ss:$0 sm:$0xff] }
 0x13f   :  { %v197_v46 = vrot.slane %v154_v42, %v174_v38 }
 0x140   :  { %v177_v52 = vsel %vm176_vm1, %v175_v45, %v170_v48  ;;  %v84_v45 = vld [vmem:[%s689_s3] sm:$0x3]  ;;  %s513_s3 = smov [#allocation5]  }
 0x141   :  { %v145_v47 = vpop.permute.xlu1 %144  ;;  %v198_v25 = vsel %vm176_vm1, %v197_v46, %v193_v51  ;;  %v227_v46 = vrot.slane %v84_v45, %v611_v26 }
 0x142   :  { %v182_v49 = vrot.slane %v145_v47, %v181_v43  ;;  %v157_v50 = vpop.permute.xlu0 %156 }
 0x143   :  { %v202_v53 = vrot.slane %v157_v50, %v181_v43  ;;  %v443_v50 = vld [vmem:[%s690_s4] ss:$0 sm:$0xff]  ;;  %s431_s4 = sshll.u32 %s513_s3, 4  ;;  %s432_s4 = int_to_ptr.vmem [resolvable:$true] %s431_s4 }
 0x144   :  { %v184_v54 = vsel %vm183_vm2, %v182_v49, %v177_v52  ;;  %v347_v49 = vrot.slane %v84_v45, %v618_v29  ;;  %s482_s12 = scalar_lea.vmem %s432_s4, 2048  ;;  %p487_p9 = scmp.lt.s32.totalorder %s432_s4, %s432_s4 }
 0x145   :  { %v272_v55 = vpop.permute.xlu1 %271  ;;  %v203_v56 = vsel %vm183_vm2, %v202_v53, %v198_v25  ;;  %p483_p8 = scmp.ne.s32.totalorder %s432_s4, %s482_s12  ;;  %p488_p10 = scmp.lt.s32.totalorder %s482_s12, %s482_s12 }
 0x146   :  { %v275_v57 = vpop.permute.xlu0 %274  ;;  %v205_v58 = vsel %vm204_vm3, %v203_v56, %v184_v54  ;;  %v297_v63 = vrot.slane %v272_v55, %v162_v35 }
 0x147   :  { %v208_v59 = vsel %vm207_vm4, %v205_v58, 0.0  ;;  %v301_v3 = vrot.slane %v275_v57, %v167_v34  ;;  %p489_p11 = por %p488_p10, %p487_p9 }
 0x148   :  { %209 = vadd.xlane.f32.xlu1 %v208_v59 }
 0x149   :  { %v284_v60 = vpop.permute.xlu1 %283  ;;  %v302_v23 = vsel %vm169_vm0, %v301_v3, %v297_v63  ;;  %p490_p12 = pnand %p489_p11, %p483_p8 }
 0x14a   :  { %v287_v61 = vpop.permute.xlu0 %286  ;;  %v316_v10 = vrot.slane %v284_v60, %v162_v35 }
 0x14b   :  { %v320_v11 = vrot.slane %v287_v61, %v167_v34 }
 0x14d   :  { %v278_v62 = vpop.permute.xlu1 %277  ;;  %v321_v30 = vsel %vm169_vm0, %v320_v11, %v316_v10 }
 0x14e   :  { %v290_v7 = vpop.permute.xlu0 %289  ;;  %v306_v16 = vrot.slane %v278_v62, %v174_v38 }
 0x14f   :  { %v325_v17 = vrot.slane %v290_v7, %v174_v38  ;;  %v512_v38 = vmov 1  }
 0x150   :  { %v307_v31 = vsel %vm176_vm1, %v306_v16, %v302_v23  ;;  %454 = vset.pattern.permute.xlu1 %v512_v38 }
 0x151   :  { %v281_v22 = vpop.permute.xlu1 %280  ;;  %v326_v33 = vsel %vm176_vm1, %v325_v17, %v321_v30 }
 0x152   :  { %v311_v27 = vrot.slane %v281_v22, %v181_v43  ;;  %v293_v28 = vpop.permute.xlu0 %292 }
 0x153   :  { %v330_v32 = vrot.slane %v293_v28, %v181_v43 }
 0x154   :  { %v312_v36 = vsel %vm183_vm2, %v311_v27, %v307_v31 }
 0x155   :  { %v331_v37 = vsel %vm183_vm2, %v330_v32, %v326_v33 }
 0x156   :  { %v332_v34 = vsel %vm204_vm3, %v331_v37, %v312_v36 }
 0x157   :  { %v334_v35 = vsel %vm207_vm4, %v332_v34, 0.0 }
 0x158   :  { %335 = vadd.xlane.f32.xlu0 %v334_v35 }
 0x1d5   :  { %v210_v40 = vpop.xlane.xlu1 %209 }
 0x1d6   :  { %v217_v41 = vadd.f32 %v444_v39, %v210_v40 }
 0x1d8   :  { %v218_v42 = vmax.f32 %v217_v41, 0.0 }
 0x1da   :  { %221 = vperm.xlu0 %452, %v218_v42  }
 0x1de   :  { %455 = vset.pattern.permute.xlu0 %v512_v38 }
 0x1e5   :  { %v336_v43 = vpop.xlane.xlu0 %335 }
 0x1e6   :  { %v337_v24 = vadd.f32 %v444_v39, %v336_v43 }
 0x1e8   :  { %v338_v44 = vmax.f32 %v337_v24, 0.0 }
 0x1ea   :  { %341 = vperm.xlu1 %454, %v338_v44  }
 0x259   :  { %v222_v47 = vpop.permute.xlu0 %221 }
 0x25a   :  { %v228_v48 = vmul.f32 %v227_v46, %v222_v47 }
 0x25c   :  { %v229_v52 = vadd.f32 %v443_v50, %v228_v48 }
 0x269   :  { %v342_v51 = vpop.permute.xlu1 %341 }
 0x26a   :  { %v348_v53 = vmul.f32 %v347_v49, %v342_v51 }
 0x26c   :  { %v349_v25 = vadd.f32 %v348_v53, %v229_v52 }
 0x26e   :  { %v445_v54 = vmul.f32 -1.442695, %v349_v25 }
 0x270   :  { %456 = vpow2.f32 %v445_v54 }
 0x27a   :  { %v457_v55 = vpop.eup %456 }
 0x27b   :  { %v353_v56 = vadd.f32 1.0, %v457_v55 }
 0x27d   :  { %458 = vrcp.f32 %v353_v56 }
 0x287   :  { %v459_v57 = vpop.eup %458 }
 0x288   :  { %v359_v58 = vrot.slane %v459_v57, %v611_v26  ;;  %v378_v59 = vrot.slane %v459_v57, %v618_v29 }
 0x28a   :  { %365 = vbcast.lane.b32.xlu0 %v359_v58, 264  ;;  %361 = vbcast.lane.b32.xlu1 %v359_v58, 256 }
 0x28e   :  { %373 = vbcast.lane.b32.xlu0 %v359_v58, 280  ;;  %369 = vbcast.lane.b32.xlu1 %v359_v58, 272 }
 0x292   :  { %384 = vbcast.lane.b32.xlu0 %v378_v59, 264  ;;  %380 = vbcast.lane.b32.xlu1 %v378_v59, 256 }
 0x296   :  { %392 = vbcast.lane.b32.xlu0 %v378_v59, 280  ;;  %388 = vbcast.lane.b32.xlu1 %v378_v59, 272 }
 0x2fc   :  { %v366_v60 = vpop.permute.xlu0 %365  ;;  %v362_v61 = vpop.permute.xlu1 %361 }
 0x2fd   :  { %v396_v62 = vmul.f32 %v366_v60, %v575_v8  ;;  %v397_v63 = vmul.f32 %v366_v60, %v577_v9  ;;  %v394_v3 = vmul.f32 %v362_v61, %v563_v2  ;;  %v395_v26 = vmul.f32 %v362_v61, %v567_v4 }
 0x2ff   :  { %412 = vst [vmem:[#allocation5 + $0x10] sm:$0xff] %v396_v62  ;;  %413 = vst [vmem:[#allocation5 + $0x18] sm:$0xff] %v397_v63 }
 0x300   :  { %410 = vst [vmem:[#allocation5] sm:$0xff] %v394_v3  ;;  %411 = vst [vmem:[#allocation5 + $0x8] sm:$0xff] %v395_v26  ;;  %v374_v7 = vpop.permute.xlu0 %373  ;;  %v370_v29 = vpop.permute.xlu1 %369 }
 0x301   :  { %v400_v10 = vmul.f32 %v374_v7, %v599_v20  ;;  %v401_v11 = vmul.f32 %v374_v7, %v601_v21  ;;  %v398_v16 = vmul.f32 %v370_v29, %v587_v14  ;;  %v399_v8 = vmul.f32 %v370_v29, %v589_v15 }
 0x303   :  { %416 = vst [vmem:[#allocation5 + $0x30] sm:$0xff] %v400_v10  ;;  %417 = vst [vmem:[#allocation5 + $0x38] sm:$0xff] %v401_v11 }
 0x304   :  { %414 = vst [vmem:[#allocation5 + $0x20] sm:$0xff] %v398_v16  ;;  %415 = vst [vmem:[#allocation5 + $0x28] sm:$0xff] %v399_v8  ;;  %v385_v2 = vpop.permute.xlu0 %384  ;;  %v381_v4 = vpop.permute.xlu1 %380 }
 0x305   :  { %v404_v9 = vmul.f32 %v385_v2, %v569_v5  ;;  %v405_v17 = vmul.f32 %v385_v2, %v571_v6  ;;  %v402_v22 = vmul.f32 %v381_v4, %v559_v0  ;;  %v403_v20 = vmul.f32 %v381_v4, %v561_v1 }
 0x307   :  { %420 = vst [vmem:[#allocation5 + $0x50] sm:$0xff] %v404_v9  ;;  %421 = vst [vmem:[#allocation5 + $0x58] sm:$0xff] %v405_v17 }
 0x308   :  { %418 = vst [vmem:[#allocation5 + $0x40] sm:$0xff] %v402_v22  ;;  %419 = vst [vmem:[#allocation5 + $0x48] sm:$0xff] %v403_v20  ;;  %v393_v14 = vpop.permute.xlu0 %392  ;;  %v389_v15 = vpop.permute.xlu1 %388 }
 0x309   :  { %v408_v21 = vmul.f32 %v393_v14, %v595_v18  ;;  %v409_v23 = vmul.f32 %v393_v14, %v597_v19  ;;  %v406_v5 = vmul.f32 %v389_v15, %v583_v12  ;;  %v407_v6 = vmul.f32 %v389_v15, %v585_v13 }
 0x30b   :  { %424 = vst [vmem:[#allocation5 + $0x70] sm:$0xff] %v408_v21  ;;  %425 = vst [vmem:[#allocation5 + $0x78] sm:$0xff] %v409_v23 }
 0x30c   :  { %422 = vst [vmem:[#allocation5 + $0x60] sm:$0xff] %v406_v5  ;;  %423 = vst [vmem:[#allocation5 + $0x68] sm:$0xff] %v407_v6 }
 0x30d   :  { %493 = shalt.err (!%p490_p12)
}
 0x30e   :  { %s494_s15 = scalar_lea.hbm %s691_s5, 2048 }
 0x30f   :  { %p495_p13 = scmp.ne.s32.totalorder %s691_s5, %s494_s15  ;;  %p498_p0 = scmp.lt.u32.totalorder %s494_s15, %s691_s5 }
 0x311   :  { %p500_p1 = pnand %p498_p0, %p495_p13 }
 0x313   :  { %503 = shalt.err (!%p500_p1)
}
 0x314   :  { %437 = dma.vmem_to_hbm [thread:$0]  %s432_s4, 2048, %s691_s5, [#allocation4], %s509_s28, %s509_s28, %s510_s29  }
 0x315   :  { %506 = dma.done.wait [#allocation4], 2048  }
 0x316   :  { %507 = vsyncadd [#allocation4], 4294965248 }
 0x317   :  { %441 = vsyncpa [#allocation3], 1 }
 0x318   :  { %442 = vsyncpa [#allocation4], 1 }

</bundles_post_ra>
